<compile_context>
chip_gen: v5e
topology: v5e:2x2
jax: 0.10.0
libtpu: 0.0.40
codegen_flags: <defaults>
</compile_context>

<pallas_src>
import functools

import jax
import jax.numpy as jnp
from jax import lax
from jax.experimental import pallas as pl
from jax.experimental.pallas import tpu as pltpu

SUBLANE = 8


def _refine_kernel(x_ref, x1_ref, w1x_ref, w1x1_ref, b1_ref, w2s_ref, b2s_ref,
                   out_ref, *, chans, in_chans, matmul_dtype):
    """One batch tile of refine.forward (eval mode).

    x_ref    : (TM, D)        x flattened per-sample (D = T*V*C)
    x1_ref   : (TM, D)        x_1 flattened per-sample
    w1x_ref  : (D, fc_unit)   rows of w1 that multiply x   (concat fused into 2 matmuls)
    w1x1_ref : (D, fc_unit)   rows of w1 that multiply x_1
    b1_ref   : (1, fc_unit)
    w2s_ref  : (fc_unit, D)   w2 with the score->flat-channel scatter pre-folded in
    b2s_ref  : (1, D)         b2 scattered the same way (zeros on pass-through cols)
    out_ref  : (TM, D)        full x_out tile
    """
    x = x_ref[...]
    x1 = x1_ref[...]

    xa = x.astype(matmul_dtype)
    x1a = x1.astype(matmul_dtype)

    # Linear 1 (+ bias) + ReLU.  Equivalent to cat((x, x_1), -1).view(N,-1) @ w1.
    h = (jnp.dot(xa, w1x_ref[...].astype(matmul_dtype),
                 preferred_element_type=jnp.float32)
         + jnp.dot(x1a, w1x1_ref[...].astype(matmul_dtype),
                   preferred_element_type=jnp.float32)
         + b1_ref[...])
    h = jnp.maximum(h, 0.0)
    # Dropout(0.5, inplace=True) -> identity in eval mode.

    # Linear 2 (+ bias) + Sigmoid, already scattered to the flat (t, v, c) layout.
    # Pass-through columns get sigmoid(0)=0.5 but are overwritten below.
    logits = jnp.dot(h.astype(matmul_dtype), w2s_ref[...].astype(matmul_dtype),
                     preferred_element_type=jnp.float32) + b2s_ref[...]
    score = jax.nn.sigmoid(logits)                       # (TM, D)

    # Blend: s*x + (1-s)*x1  ==  x1 + s*(x - x1)   (one fewer multiply).
    blend = x1 + score * (x - x1)

    # Channels >= in_channels must be bit-exact copies of x (torch x.clone()).
    lane = lax.broadcasted_iota(jnp.int32, x.shape, 1)
    keep = (lane % chans) >= in_chans                    # (TM, D) bool
    out_ref[...] = jnp.where(keep, x, blend)


def refine_forward(x, x_1, params, in_channels, *,
                   matmul_dtype=jnp.float32, block_m=512):
    """JAX wrapper reproducing refine.forward (eval mode)."""
    N, T, V, C = x.shape
    w1, b1, w2, b2 = params
    D = T * V * C                       # flat per-sample width of x / x_out
    F = T * V * in_channels             # fc_out
    fc_unit = w1.shape[1]
    assert w1.shape == (2 * D, fc_unit) and w2.shape == (fc_unit, F)

    # ---- one-time weight prep (replaces the runtime concat) ----------------
    # concat layout rows: ((t*V + v)*2C + k); k < C -> x channel k, else x_1.
    w1r = w1.reshape(T * V, 2, C, fc_unit)
    w1_x = w1r[:, 0].reshape(D, fc_unit)
    w1_x1 = w1r[:, 1].reshape(D, fc_unit)
    b1r = b1.reshape(1, fc_unit)

    # ---- fold the score -> flat-channel scatter into w2 / b2 (exact gather) ----
    d = jnp.arange(D)
    c = d % C
    tv = d // C
    valid = c < in_channels
    col = jnp.where(valid, tv * in_channels + c, 0)            # score column per flat pos
    w2s = jnp.where(valid[None, :], w2[:, col], 0.0)           # (fc_unit, D)
    b2s = jnp.where(valid, b2[col], 0.0).reshape(1, D)         # (1, D)

    # ---- batch tiling / padding ---------------------------------------------
    x_flat = x.reshape(N, D).astype(jnp.float32)
    x1_flat = x_1.reshape(N, D).astype(jnp.float32)
    tm = min(block_m, max(SUBLANE, pl.cdiv(N, SUBLANE) * SUBLANE))
    n_pad = pl.cdiv(N, tm) * tm
    if n_pad != N:
        x_flat = jnp.pad(x_flat, ((0, n_pad - N), (0, 0)))
        x1_flat = jnp.pad(x1_flat, ((0, n_pad - N), (0, 0)))

    grid = (n_pad // tm,)
    row_spec = pl.BlockSpec((tm, D), lambda i: (i, 0))
    full = lambda shape: pl.BlockSpec(shape, lambda i: (0, 0))

    flops = 2 * n_pad * (2 * D * fc_unit + fc_unit * D)
    bytes_accessed = 4 * (3 * n_pad * D                        # x, x_1, x_out
                          + 2 * D * fc_unit + fc_unit * D + fc_unit + D)

    out_flat = pl.pallas_call(
        functools.partial(_refine_kernel, chans=C, in_chans=in_channels,
                          matmul_dtype=matmul_dtype),
        out_shape=jax.ShapeDtypeStruct((n_pad, D), jnp.float32),
        grid=grid,
        in_specs=[row_spec, row_spec,
                  full((D, fc_unit)), full((D, fc_unit)), full((1, fc_unit)),
                  full((fc_unit, D)), full((1, D))],
        out_specs=row_spec,
        input_output_aliases={0: 0},           # reuse x_flat's buffer for x_out
        compiler_params=pltpu.CompilerParams(
            dimension_semantics=("parallel",)),  # shard batch tiles across TCs (v7x)
        cost_estimate=pl.CostEstimate(flops=flops,
                                      transcendentals=n_pad * D,
                                      bytes_accessed=bytes_accessed),
    )(x_flat, x1_flat, w1_x, w1_x1, b1r, w2s, b2s)

    return out_flat[:N].reshape(N, T, V, C)


def init_params(key, fc_in, fc_unit, fc_out):
    """Deterministic init mimicking nn.Linear defaults (uniform +-1/sqrt(fan_in))."""
    k1, k2, k3, k4 = jax.random.split(key, 4)
    lim1 = 1.0 / jnp.sqrt(fc_in)
    lim2 = 1.0 / jnp.sqrt(fc_unit)
    w1 = jax.random.uniform(k1, (fc_in, fc_unit), jnp.float32, -lim1, lim1)
    b1 = jax.random.uniform(k2, (fc_unit,), jnp.float32, -lim1, lim1)
    w2 = jax.random.uniform(k3, (fc_unit, fc_out), jnp.float32, -lim2, lim2)
    b2 = jax.random.uniform(k4, (fc_out,), jnp.float32, -lim2, lim2)
    return w1, b1, w2, b2


def refine_reference(x, x_1, params, in_channels):
    """Pure-JAX reference (torch layout: concat + one matmul + scatter-assign)."""
    N, T, V, C = x.shape
    w1, b1, w2, b2 = params
    x_in = jnp.concatenate([x, x_1], axis=-1).reshape(N, -1)
    h = jnp.maximum(x_in @ w1 + b1, 0.0)
    score = jax.nn.sigmoid(h @ w2 + b2).reshape(N, T, V, in_channels)
    blended = score * x[..., :in_channels] + (1.0 - score) * x_1[..., :in_channels]
    return x.at[..., :in_channels].set(blended)


if __name__ == "__main__":
    # Small shapes consistent with the module:
    # opt.out_channels=4, opt.in_channels=2, opt.n_joints=8, out_seqlen(T)=1, N=2
    N, T, V = 2, 1, 8
    out_channels, in_channels = 4, 2
    fc_unit = 1024
    fc_in = out_channels * 2 * T * V          # 64
    fc_out = in_channels * T * V              # 16

    key = jax.random.PRNGKey(0)
    kx, kx1, kp = jax.random.split(key, 3)
    x = jax.random.normal(kx, (N, T, V, out_channels), jnp.float32)
    x_1 = jax.random.normal(kx1, (N, T, V, out_channels), jnp.float32)
    params = init_params(kp, fc_in, fc_unit, fc_out)

    out = refine_forward(x, x_1, params, in_channels)
    out = jax.block_until_ready(out)

    ref = refine_reference(x, x_1, params, in_channels)
    assert out.shape == (N, T, V, out_channels)
    assert jnp.allclose(out, ref, atol=5e-5, rtol=5e-5), "mismatch vs reference"
    # channels >= in_channels must be untouched (bit-exact) copies of x
    assert jnp.array_equal(out[..., in_channels:], x[..., in_channels:])

    # TODO(synk): for v6e/v7x throughput at large batch, call with
    # matmul_dtype=jnp.bfloat16 (loosen the reference tolerance accordingly).
    print("KERNEL_OK")
</pallas_src>

<mosaic_0001>
module attributes {stable_mosaic.version = 11 : i64} {
  func.func @_refine_kernel(%arg0: i32, %arg1: memref<8x32xf32, #tpu.memory_space<vmem>>, %arg2: memref<8x32xf32, #tpu.memory_space<vmem>>, %arg3: memref<32x1024xf32, #tpu.memory_space<vmem>>, %arg4: memref<32x1024xf32, #tpu.memory_space<vmem>>, %arg5: memref<1x1024xf32, #tpu.memory_space<vmem>>, %arg6: memref<1024x32xf32, #tpu.memory_space<vmem>>, %arg7: memref<1x32xf32, #tpu.memory_space<vmem>>, %arg8: memref<8x32xf32, #tpu.memory_space<vmem>>) attributes {dimension_semantics = [#tpu.dimension_semantics<parallel>], iteration_bounds = array<i64: 1>, scalar_prefetch = 0 : i64, scratch_operands = 0 : i64, tpu.core_type = #tpu.core_type<tc>, window_params = [{transform_indices = @transform_0, window_bounds = array<i64: 8, 32>}, {transform_indices = @transform_1, window_bounds = array<i64: 8, 32>}, {pipeline_mode = #tpu.pipeline_mode<synchronous>, transform_indices = @transform_2, window_bounds = array<i64: 32, 1024>}, {pipeline_mode = #tpu.pipeline_mode<synchronous>, transform_indices = @transform_3, window_bounds = array<i64: 32, 1024>}, {pipeline_mode = #tpu.pipeline_mode<synchronous>, transform_indices = @transform_4, window_bounds = array<i64: 1, 1024>}, {pipeline_mode = #tpu.pipeline_mode<synchronous>, transform_indices = @transform_5, window_bounds = array<i64: 1024, 32>}, {pipeline_mode = #tpu.pipeline_mode<synchronous>, transform_indices = @transform_6, window_bounds = array<i64: 1, 32>}, {transform_indices = @transform_7, window_bounds = array<i64: 8, 32>}]} {
    %c0 = arith.constant 0 : index
    %c0_0 = arith.constant 0 : index
    %0 = vector.load %arg1[%c0, %c0_0] : memref<8x32xf32, #tpu.memory_space<vmem>>, vector<8x32xf32>
    %c0_1 = arith.constant 0 : index
    %c0_2 = arith.constant 0 : index
    %1 = vector.load %arg2[%c0_1, %c0_2] : memref<8x32xf32, #tpu.memory_space<vmem>>, vector<8x32xf32>
    %c0_3 = arith.constant 0 : index
    %c0_4 = arith.constant 0 : index
    %2 = vector.load %arg3[%c0_3, %c0_4] : memref<32x1024xf32, #tpu.memory_space<vmem>>, vector<32x1024xf32>
    %cst = arith.constant dense<0.000000e+00> : vector<8x1024xf32>
    %3 = tpu.matmul %0, %2, %cst {dimension_numbers = #tpu.dot_dimension_numbers<[1], [0], [0], [1], [0, 0, 1, 1], [], []>} : vector<8x32xf32>, vector<32x1024xf32>, vector<8x1024xf32> -> vector<8x1024xf32>
    %c0_5 = arith.constant 0 : index
    %c0_6 = arith.constant 0 : index
    %4 = vector.load %arg4[%c0_5, %c0_6] : memref<32x1024xf32, #tpu.memory_space<vmem>>, vector<32x1024xf32>
    %cst_7 = arith.constant dense<0.000000e+00> : vector<8x1024xf32>
    %5 = tpu.matmul %1, %4, %cst_7 {dimension_numbers = #tpu.dot_dimension_numbers<[1], [0], [0], [1], [0, 0, 1, 1], [], []>} : vector<8x32xf32>, vector<32x1024xf32>, vector<8x1024xf32> -> vector<8x1024xf32>
    %6 = arith.addf %3, %5 : vector<8x1024xf32>
    %c0_8 = arith.constant 0 : index
    %c0_9 = arith.constant 0 : index
    %7 = vector.load %arg5[%c0_8, %c0_9] : memref<1x1024xf32, #tpu.memory_space<vmem>>, vector<1x1024xf32>
    %8 = vector.broadcast %7 : vector<1x1024xf32> to vector<8x1024xf32>
    %9 = arith.addf %6, %8 : vector<8x1024xf32>
    %cst_10 = arith.constant 0.000000e+00 : f32
    %10 = vector.broadcast %cst_10 : f32 to vector<8x1024xf32>
    %11 = arith.maximumf %9, %10 : vector<8x1024xf32>
    %c0_11 = arith.constant 0 : index
    %c0_12 = arith.constant 0 : index
    %12 = vector.load %arg6[%c0_11, %c0_12] : memref<1024x32xf32, #tpu.memory_space<vmem>>, vector<1024x32xf32>
    %cst_13 = arith.constant dense<0.000000e+00> : vector<8x32xf32>
    %13 = tpu.matmul %11, %12, %cst_13 {dimension_numbers = #tpu.dot_dimension_numbers<[1], [0], [0], [1], [0, 0, 1, 1], [], []>} : vector<8x1024xf32>, vector<1024x32xf32>, vector<8x32xf32> -> vector<8x32xf32>
    %c0_14 = arith.constant 0 : index
    %c0_15 = arith.constant 0 : index
    %14 = vector.load %arg7[%c0_14, %c0_15] : memref<1x32xf32, #tpu.memory_space<vmem>>, vector<1x32xf32>
    %15 = vector.broadcast %14 : vector<1x32xf32> to vector<8x32xf32>
    %16 = arith.addf %13, %15 : vector<8x32xf32>
    %17 = arith.negf %16 : vector<8x32xf32>
    %18 = math.exp %17 : vector<8x32xf32>
    %cst_16 = arith.constant 1.000000e+00 : f32
    %19 = vector.broadcast %cst_16 : f32 to vector<8x32xf32>
    %20 = arith.addf %19, %18 : vector<8x32xf32>
    %21 = arith.divf %19, %20 : vector<8x32xf32>
    %22 = arith.subf %0, %1 : vector<8x32xf32>
    %23 = arith.mulf %21, %22 : vector<8x32xf32>
    %24 = arith.addf %1, %23 : vector<8x32xf32>
    %25 = tpu.iota {dimensions = array<i32: 1>} : vector<8x32xi32>
    %c4_i32 = arith.constant 4 : i32
    %c0_i32 = arith.constant 0 : i32
    %26 = arith.cmpi eq, %c4_i32, %c0_i32 : i32
    %c1_i32 = arith.constant 1 : i32
    %27 = arith.select %26, %c1_i32, %c4_i32 : i32
    %28 = vector.broadcast %27 : i32 to vector<8x32xi32>
    %29 = arith.remsi %25, %28 : vector<8x32xi32>
    %c0_i32_17 = arith.constant 0 : i32
    %30 = vector.broadcast %c0_i32_17 : i32 to vector<8x32xi32>
    %31 = arith.cmpi ne, %29, %30 : vector<8x32xi32>
    %c0_i32_18 = arith.constant 0 : i32
    %32 = vector.broadcast %c0_i32_18 : i32 to vector<8x32xi32>
    %33 = arith.cmpi slt, %29, %32 : vector<8x32xi32>
    %c0_i32_19 = arith.constant 0 : i32
    %34 = arith.cmpi slt, %27, %c0_i32_19 : i32
    %35 = vector.broadcast %34 : i1 to vector<8x32xi1>
    %36 = vector.broadcast %35 : vector<8x32xi1> to vector<8x32xi1>
    %37 = arith.xori %33, %36 : vector<8x32xi1>
    %38 = arith.andi %37, %31 : vector<8x32xi1>
    %39 = vector.broadcast %27 : i32 to vector<8x32xi32>
    %40 = arith.addi %29, %39 : vector<8x32xi32>
    %41 = arith.select %38, %40, %29 : vector<8x32xi1>, vector<8x32xi32>
    %c2_i32 = arith.constant 2 : i32
    %42 = vector.broadcast %c2_i32 : i32 to vector<8x32xi32>
    %43 = arith.cmpi sge, %41, %42 : vector<8x32xi32>
    %44 = arith.select %43, %0, %24 : vector<8x32xi1>, vector<8x32xf32>
    %c0_20 = arith.constant 0 : index
    %c0_21 = arith.constant 0 : index
    %45 = vector.load %arg8[%c0_20, %c0_21] : memref<8x32xf32, #tpu.memory_space<vmem>>, vector<8x32xf32>
    tpu.vector_store %arg8[%c0_20, %c0_21], %44 {strides = array<i32>} : memref<8x32xf32, #tpu.memory_space<vmem>>, vector<8x32xf32>,
    return
  }
  func.func @transform_0(%arg0: i32) -> (i32, i32) {
    %c0_i32 = arith.constant 0 : i32
    %c0_i32_0 = arith.constant 0 : i32
    return %arg0, %c0_i32 : i32, i32
  }
  func.func @transform_1(%arg0: i32) -> (i32, i32) {
    %c0_i32 = arith.constant 0 : i32
    %c0_i32_0 = arith.constant 0 : i32
    return %arg0, %c0_i32 : i32, i32
  }
  func.func @transform_2(%arg0: i32) -> (i32, i32) {
    %c0_i32 = arith.constant 0 : i32
    %c0_i32_0 = arith.constant 0 : i32
    %c0_i32_1 = arith.constant 0 : i32
    return %c0_i32, %c0_i32_0 : i32, i32
  }
  func.func @transform_3(%arg0: i32) -> (i32, i32) {
    %c0_i32 = arith.constant 0 : i32
    %c0_i32_0 = arith.constant 0 : i32
    %c0_i32_1 = arith.constant 0 : i32
    return %c0_i32, %c0_i32_0 : i32, i32
  }
  func.func @transform_4(%arg0: i32) -> (i32, i32) {
    %c0_i32 = arith.constant 0 : i32
    %c0_i32_0 = arith.constant 0 : i32
    %c0_i32_1 = arith.constant 0 : i32
    return %c0_i32, %c0_i32_0 : i32, i32
  }
  func.func @transform_5(%arg0: i32) -> (i32, i32) {
    %c0_i32 = arith.constant 0 : i32
    %c0_i32_0 = arith.constant 0 : i32
    %c0_i32_1 = arith.constant 0 : i32
    return %c0_i32, %c0_i32_0 : i32, i32
  }
  func.func @transform_6(%arg0: i32) -> (i32, i32) {
    %c0_i32 = arith.constant 0 : i32
    %c0_i32_0 = arith.constant 0 : i32
    %c0_i32_1 = arith.constant 0 : i32
    return %c0_i32, %c0_i32_0 : i32, i32
  }
  func.func @transform_7(%arg0: i32) -> (i32, i32) {
    %c0_i32 = arith.constant 0 : i32
    %c0_i32_0 = arith.constant 0 : i32
    return %arg0, %c0_i32 : i32, i32
  }
}

</mosaic_0001>

<bundles_post_ra>
// kernel: tpu_custom_call.1
= control target key start
LH: loop header
LB: loop body
LE: loop exit
PB: predicated region body
PF: predicated region fallthrough
CT: control target
= control target key end

     0   :  { %12 = vsyncpa [#allocation3], 0  ;;  %s1566_s0 = inlined_call_operand.hbm [shape: f32[8,32], index: 0, kind: input, shape index: {}, may-alias: {0,7}]   ;;  %s1567_s1 = inlined_call_operand.vmem [shape: f32[8,32], index: 1, kind: input, shape index: {}]   ;;  %s1568_s2 = inlined_call_operand.vmem [shape: f32[32,1024], index: 2, kind: input, shape index: {}]   ;;  %s1569_s3 = inlined_call_operand.vmem [shape: f32[32,1024], index: 3, kind: input, shape index: {}]   ;;  %s1570_s4 = inlined_call_operand.vmem [shape: f32[1,1024], index: 4, kind: input, shape index: {}]   ;;  %s1571_s5 = inlined_call_operand.vmem [shape: f32[1024,32], index: 5, kind: input, shape index: {}]   ;;  %s1572_s6 = inlined_call_operand.vmem [shape: f32[1,32], index: 6, kind: input, shape index: {}]   ;;  %s1573_s7 = inlined_call_operand.hbm [shape: f32[8,32], index: 7, kind: output, shape index: {}, may-alias: {0,7}]  }
   0x1   :  { %13 = vsyncpa [#allocation4], 0  ;;  %s19_s26 = sshll.u32 %s1566_s0, 4  ;;  %s892_s27 = smov [#allocation2]   ;;  %s20_s26 = int_to_ptr.hbm [resolvable:$true] %s19_s26 }
   0x2   :  { %s21_s28 = sshll.u32 %s892_s27, 4  ;;  %s22_s28 = int_to_ptr.vmem [resolvable:$true] %s21_s28 }
   0x3   :  { %24 = dma.hbm_to_vmem [thread:$0]  %s20_s26, 128, %s22_s28, [#allocation3]  }
   0x4   :  { %888 = dma.done.wait [#allocation3], 128  }
   0x5   :  { %889 = vsyncadd [#allocation3], 4294967168  ;;  %v99_v0 = vld [vmem:[%s1569_s3 + $0xc0] sm:$0xff]  ;;  %v100_v1 = vld [vmem:[%s1569_s3 + $0xc8] sm:$0xff]  ;;  %vm107_vm0 = vcmask 261120   ;;  %s806_s24 = sshll.u32 %s1573_s7, 4  ;;  %s807_s24 = int_to_ptr.hbm [resolvable:$true] %s806_s24 }
   0x6   :  { %v101_v2 = vld [vmem:[%s1569_s3 + $0xd0] sm:$0xff]  ;;  %123 = vmatpush.msra.mxu0 %v99_v0  ;;  %143 = vmatpush.msra.mxu1 %v100_v1  ;;  %v102_v3 = vld [vmem:[%s1569_s3 + $0xd8] sm:$0xff]  ;;  %v91_v4 = vld [vmem:[%s1569_s3 + $0x80] sm:$0xff] }
   0x7   :  { %v92_v5 = vld [vmem:[%s1569_s3 + $0x88] sm:$0xff]  ;;  %163 = vmatpush.msra.mxu2 %v101_v2  ;;  %183 = vmatpush.msra.mxu3 %v102_v3  ;;  %v93_v6 = vld [vmem:[%s1569_s3 + $0x90] sm:$0xff]  ;;  %v94_v7 = vld [vmem:[%s1569_s3 + $0x98] sm:$0xff] }
   0x8   :  { %v83_v8 = vld [vmem:[%s1569_s3 + $0x40] sm:$0xff]  ;;  %124 = vmatpush.msra.mxu0 %v91_v4  ;;  %144 = vmatpush.msra.mxu1 %v92_v5  ;;  %v84_v9 = vld [vmem:[%s1569_s3 + $0x48] sm:$0xff]  ;;  %v85_v10 = vld [vmem:[%s1569_s3 + $0x50] sm:$0xff] }
   0x9   :  { %v86_v11 = vld [vmem:[%s1569_s3 + $0x58] sm:$0xff]  ;;  %164 = vmatpush.msra.mxu2 %v93_v6  ;;  %184 = vmatpush.msra.mxu3 %v94_v7  ;;  %v75_v12 = vld [vmem:[%s1569_s3] sm:$0xff]  ;;  %v76_v13 = vld [vmem:[%s1569_s3 + $0x8] sm:$0xff] }
   0xa   :  { %125 = vmatpush.msra.mxu0 %v83_v8  ;;  %145 = vmatpush.msra.mxu1 %v84_v9  ;;  %v77_v14 = vld [vmem:[%s1569_s3 + $0x10] sm:$0xff]  ;;  %v78_v15 = vld [vmem:[%s1569_s3 + $0x18] sm:$0xff]  ;;  %v988_v16 = vld [vmem:[%s1567_s1] sm:$0xff] }
   0xb   :  { %165 = vmatpush.msra.mxu2 %v85_v10  ;;  %185 = vmatpush.msra.mxu3 %v86_v11  ;;  %v105_v17 = vld [vmem:[%s1569_s3 + $0xf0] sm:$0xff]  ;;  %v103_v18 = vld [vmem:[%s1569_s3 + $0xe0] sm:$0xff]  ;;  %v104_v19 = vld [vmem:[%s1569_s3 + $0xe8] sm:$0xff] }
   0xc   :  { %126 = vmatpush.msra.mxu0 %v75_v12  ;;  %146 = vmatpush.msra.mxu1 %v76_v13  ;;  %v106_v20 = vld [vmem:[%s1569_s3 + $0xf8] sm:$0xff]  ;;  %v97_v21 = vld [vmem:[%s1569_s3 + $0xb0] sm:$0xff]  ;;  %v95_v22 = vld [vmem:[%s1569_s3 + $0xa0] sm:$0xff] }
   0xd   :  { %166 = vmatpush.msra.mxu2 %v77_v14  ;;  %186 = vmatpush.msra.mxu3 %v78_v15  ;;  %v96_v23 = vld [vmem:[%s1569_s3 + $0xa8] sm:$0xff]  ;;  %v98_v24 = vld [vmem:[%s1569_s3 + $0xb8] sm:$0xff]  ;;  %v89_v25 = vld [vmem:[%s1569_s3 + $0x70] sm:$0xff] }
   0xe   :  { %816 = vmatmul.msk.f32.vlgmr.msra.gmra.mxu0 %vm107_vm0, %v988_v16  ;;  %817 = vmatmul.msk.f32.vlgmr.msra.gmra.mxu1 %vm107_vm0, %v988_v16  ;;  %v87_v26 = vld [vmem:[%s1569_s3 + $0x60] sm:$0xff]  ;;  %v88_v27 = vld [vmem:[%s1569_s3 + $0x68] sm:$0xff]  ;;  %v90_v28 = vld [vmem:[%s1569_s3 + $0x78] sm:$0xff] }
   0xf   :  { %818 = vmatmul.msk.f32.vlgmr.msra.gmra.mxu2 %vm107_vm0, %v988_v16  ;;  %819 = vmatmul.msk.f32.vlgmr.msra.gmra.mxu3 %vm107_vm0, %v988_v16  ;;  %v81_v29 = vld [vmem:[%s1569_s3 + $0x30] sm:$0xff]  ;;  %v79_v30 = vld [vmem:[%s1569_s3 + $0x20] sm:$0xff]  ;;  %v80_v31 = vld [vmem:[%s1569_s3 + $0x28] sm:$0xff] }
  0x10   :  { %243 = vmatpush.msrb.mxu2 %v105_v17  ;;  %203 = vmatpush.msrb.mxu0 %v103_v18  ;;  %v82_v32 = vld [vmem:[%s1569_s3 + $0x38] sm:$0xff]  ;;  %v69_v33 = vld [vmem:[%s1568_s2 + $0xd0] sm:$0xff]  ;;  %v67_v34 = vld [vmem:[%s1568_s2 + $0xc0] sm:$0xff] }
  0x11   :  { %223 = vmatpush.msrb.mxu1 %v104_v19  ;;  %263 = vmatpush.msrb.mxu3 %v106_v20  ;;  %v68_v35 = vld [vmem:[%s1568_s2 + $0xc8] sm:$0xff]  ;;  %v70_v36 = vld [vmem:[%s1568_s2 + $0xd8] sm:$0xff]  ;;  %v61_v37 = vld [vmem:[%s1568_s2 + $0x90] sm:$0xff] }
  0x12   :  { %244 = vmatpush.msrb.mxu2 %v97_v21  ;;  %204 = vmatpush.msrb.mxu0 %v95_v22  ;;  %v59_v38 = vld [vmem:[%s1568_s2 + $0x80] sm:$0xff]  ;;  %v60_v39 = vld [vmem:[%s1568_s2 + $0x88] sm:$0xff]  ;;  %v62_v40 = vld [vmem:[%s1568_s2 + $0x98] sm:$0xff] }
  0x13   :  { %224 = vmatpush.msrb.mxu1 %v96_v23  ;;  %264 = vmatpush.msrb.mxu3 %v98_v24  ;;  %v53_v41 = vld [vmem:[%s1568_s2 + $0x50] sm:$0xff]  ;;  %v51_v42 = vld [vmem:[%s1568_s2 + $0x40] sm:$0xff]  ;;  %v52_v43 = vld [vmem:[%s1568_s2 + $0x48] sm:$0xff] }
  0x14   :  { %245 = vmatpush.msrb.mxu2 %v89_v25  ;;  %205 = vmatpush.msrb.mxu0 %v87_v26  ;;  %v54_v44 = vld [vmem:[%s1568_s2 + $0x58] sm:$0xff]  ;;  %v45_v45 = vld [vmem:[%s1568_s2 + $0x10] sm:$0xff]  ;;  %v43_v46 = vld [vmem:[%s1568_s2] sm:$0xff] }
  0x15   :  { %225 = vmatpush.msrb.mxu1 %v88_v27  ;;  %265 = vmatpush.msrb.mxu3 %v90_v28  ;;  %v44_v47 = vld [vmem:[%s1568_s2 + $0x8] sm:$0xff]  ;;  %v46_v48 = vld [vmem:[%s1568_s2 + $0x18] sm:$0xff]  ;;  %v1102_v49 = vld [vmem:[#allocation2] sm:$0xff] }
  0x16   :  { %246 = vmatpush.msrb.mxu2 %v81_v29  ;;  %206 = vmatpush.msrb.mxu0 %v79_v30  ;;  %v73_v50 = vld [vmem:[%s1568_s2 + $0xf0] sm:$0xff]  ;;  %v71_v51 = vld [vmem:[%s1568_s2 + $0xe0] sm:$0xff]  ;;  %v72_v52 = vld [vmem:[%s1568_s2 + $0xe8] sm:$0xff] }
  0x17   :  { %226 = vmatpush.msrb.mxu1 %v80_v31  ;;  %266 = vmatpush.msrb.mxu3 %v82_v32  ;;  %v74_v53 = vld [vmem:[%s1568_s2 + $0xf8] sm:$0xff]  ;;  %v65_v54 = vld [vmem:[%s1568_s2 + $0xb0] sm:$0xff]  ;;  %v63_v55 = vld [vmem:[%s1568_s2 + $0xa0] sm:$0xff] }
  0x18   :  { %820 = vmatmul.msk.f32.vlgmr.msrb.gmra.mxu0 %vm107_vm0, %v988_v16  ;;  %821 = vmatmul.msk.f32.vlgmr.msrb.gmra.mxu1 %vm107_vm0, %v988_v16  ;;  %v64_v56 = vld [vmem:[%s1568_s2 + $0xa8] sm:$0xff]  ;;  %v66_v57 = vld [vmem:[%s1568_s2 + $0xb8] sm:$0xff]  ;;  %v57_v58 = vld [vmem:[%s1568_s2 + $0x70] sm:$0xff] }
  0x19   :  { %822 = vmatmul.msk.f32.vlgmr.msrb.gmra.mxu2 %vm107_vm0, %v988_v16  ;;  %823 = vmatmul.msk.f32.vlgmr.msrb.gmra.mxu3 %vm107_vm0, %v988_v16  ;;  %v55_v59 = vld [vmem:[%s1568_s2 + $0x60] sm:$0xff]  ;;  %v56_v60 = vld [vmem:[%s1568_s2 + $0x68] sm:$0xff]  ;;  %v58_v61 = vld [vmem:[%s1568_s2 + $0x78] sm:$0xff] }
  0x1a   :  { %326 = vmatpush.msra.mxu2 %v69_v33  ;;  %286 = vmatpush.msra.mxu0 %v67_v34  ;;  %v49_v62 = vld [vmem:[%s1568_s2 + $0x30] sm:$0xff]  ;;  %v47_v63 = vld [vmem:[%s1568_s2 + $0x20] sm:$0xff]  ;;  %v48_v0 = vld [vmem:[%s1568_s2 + $0x28] sm:$0xff] }
  0x1b   :  { %306 = vmatpush.msra.mxu1 %v68_v35  ;;  %346 = vmatpush.msra.mxu3 %v70_v36  ;;  %v50_v1 = vld [vmem:[%s1568_s2 + $0x38] sm:$0xff]  ;;  %v482_v6 = vld [vmem:[%s1571_s5 + $0x70] sm:$0xff]  ;;  %v481_v10 = vld [vmem:[%s1571_s5 + $0x68] sm:$0xff] }
  0x1c   :  { %327 = vmatpush.msra.mxu2 %v61_v37  ;;  %287 = vmatpush.msra.mxu0 %v59_v38  ;;  %v483_v2 = vld [vmem:[%s1571_s5 + $0x78] sm:$0xff]  ;;  %v498_v7 = vld [vmem:[%s1571_s5 + $0xf0] sm:$0xff]  ;;  %v497_v11 = vld [vmem:[%s1571_s5 + $0xe8] sm:$0xff] }
  0x1d   :  { %307 = vmatpush.msra.mxu1 %v60_v39  ;;  %347 = vmatpush.msra.mxu3 %v62_v40  ;;  %v499_v3 = vld [vmem:[%s1571_s5 + $0xf8] sm:$0xff]  ;;  %v514_v8 = vld [vmem:[%s1571_s5 + $0x170] sm:$0xff]  ;;  %v513_v12 = vld [vmem:[%s1571_s5 + $0x168] sm:$0xff] }
  0x1e   :  { %328 = vmatpush.msra.mxu2 %v53_v41  ;;  %288 = vmatpush.msra.mxu0 %v51_v42  ;;  %v515_v4 = vld [vmem:[%s1571_s5 + $0x178] sm:$0xff]  ;;  %v530_v9 = vld [vmem:[%s1571_s5 + $0x1f0] sm:$0xff]  ;;  %v529_v13 = vld [vmem:[%s1571_s5 + $0x1e8] sm:$0xff] }
  0x1f   :  { %308 = vmatpush.msra.mxu1 %v52_v43  ;;  %348 = vmatpush.msra.mxu3 %v54_v44  ;;  %v531_v5 = vld [vmem:[%s1571_s5 + $0x1f8] sm:$0xff]  ;;  %v480_v14 = vld [vmem:[%s1571_s5 + $0x60] sm:$0xff]  ;;  %v478_v23 = vld [vmem:[%s1571_s5 + $0x50] sm:$0xff] }
  0x20   :  { %329 = vmatpush.msra.mxu2 %v45_v45  ;;  %289 = vmatpush.msra.mxu0 %v43_v46  ;;  %v496_v15 = vld [vmem:[%s1571_s5 + $0xe0] sm:$0xff]  ;;  %v479_v19 = vld [vmem:[%s1571_s5 + $0x58] sm:$0xff]  ;;  %v494_v24 = vld [vmem:[%s1571_s5 + $0xd0] sm:$0xff] }
  0x21   :  { %309 = vmatpush.msra.mxu1 %v44_v47  ;;  %349 = vmatpush.msra.mxu3 %v46_v48  ;;  %v512_v17 = vld [vmem:[%s1571_s5 + $0x160] sm:$0xff]  ;;  %v495_v20 = vld [vmem:[%s1571_s5 + $0xd8] sm:$0xff]  ;;  %v510_v25 = vld [vmem:[%s1571_s5 + $0x150] sm:$0xff] }
  0x22   :  { %824 = vmatmul.msk.f32.vlgmr.msra.gmra.mxu0 %vm107_vm0, %v1102_v49  ;;  %825 = vmatmul.msk.f32.vlgmr.msra.gmra.mxu1 %vm107_vm0, %v1102_v49  ;;  %v528_v18 = vld [vmem:[%s1571_s5 + $0x1e0] sm:$0xff]  ;;  %v511_v21 = vld [vmem:[%s1571_s5 + $0x158] sm:$0xff]  ;;  %v526_v26 = vld [vmem:[%s1571_s5 + $0x1d0] sm:$0xff] }
  0x23   :  { %826 = vmatmul.msk.f32.vlgmr.msra.gmra.mxu2 %vm107_vm0, %v1102_v49  ;;  %827 = vmatmul.msk.f32.vlgmr.msra.gmra.mxu3 %vm107_vm0, %v1102_v49  ;;  %v527_v22 = vld [vmem:[%s1571_s5 + $0x1d8] sm:$0xff]  ;;  %v477_v27 = vld [vmem:[%s1571_s5 + $0x48] sm:$0xff]  ;;  %v476_v31 = vld [vmem:[%s1571_s5 + $0x40] sm:$0xff] }
  0x24   :  { %406 = vmatpush.msrb.mxu2 %v73_v50  ;;  %366 = vmatpush.msrb.mxu0 %v71_v51  ;;  %v493_v28 = vld [vmem:[%s1571_s5 + $0xc8] sm:$0xff]  ;;  %v492_v32 = vld [vmem:[%s1571_s5 + $0xc0] sm:$0xff]  ;;  %v475_v35 = vld [vmem:[%s1571_s5 + $0x38] sm:$0xff] }
  0x25   :  { %386 = vmatpush.msrb.mxu1 %v72_v52  ;;  %426 = vmatpush.msrb.mxu3 %v74_v53  ;;  %v509_v29 = vld [vmem:[%s1571_s5 + $0x148] sm:$0xff]  ;;  %v508_v33 = vld [vmem:[%s1571_s5 + $0x140] sm:$0xff]  ;;  %v491_v36 = vld [vmem:[%s1571_s5 + $0xb8] sm:$0xff] }
  0x26   :  { %407 = vmatpush.msrb.mxu2 %v65_v54  ;;  %367 = vmatpush.msrb.mxu0 %v63_v55  ;;  %v525_v30 = vld [vmem:[%s1571_s5 + $0x1c8] sm:$0xff]  ;;  %v524_v34 = vld [vmem:[%s1571_s5 + $0x1c0] sm:$0xff]  ;;  %v507_v37 = vld [vmem:[%s1571_s5 + $0x138] sm:$0xff] }
  0x27   :  { %387 = vmatpush.msrb.mxu1 %v64_v56  ;;  %427 = vmatpush.msrb.mxu3 %v66_v57  ;;  %v523_v38 = vld [vmem:[%s1571_s5 + $0x1b8] sm:$0xff]  ;;  %v474_v39 = vld [vmem:[%s1571_s5 + $0x30] sm:$0xff]  ;;  %v473_v43 = vld [vmem:[%s1571_s5 + $0x28] sm:$0xff] }
  0x28   :  { %408 = vmatpush.msrb.mxu2 %v57_v58  ;;  %368 = vmatpush.msrb.mxu0 %v55_v59  ;;  %v490_v40 = vld [vmem:[%s1571_s5 + $0xb0] sm:$0xff]  ;;  %v489_v44 = vld [vmem:[%s1571_s5 + $0xa8] sm:$0xff]  ;;  %v472_v47 = vld [vmem:[%s1571_s5 + $0x20] sm:$0xff] }
  0x29   :  { %388 = vmatpush.msrb.mxu1 %v56_v60  ;;  %428 = vmatpush.msrb.mxu3 %v58_v61  ;;  %v506_v41 = vld [vmem:[%s1571_s5 + $0x130] sm:$0xff]  ;;  %v505_v45 = vld [vmem:[%s1571_s5 + $0x128] sm:$0xff]  ;;  %v488_v48 = vld [vmem:[%s1571_s5 + $0xa0] sm:$0xff] }
  0x2a   :  { %409 = vmatpush.msrb.mxu2 %v49_v62  ;;  %369 = vmatpush.msrb.mxu0 %v47_v63  ;;  %v522_v42 = vld [vmem:[%s1571_s5 + $0x1b0] sm:$0xff]  ;;  %v521_v46 = vld [vmem:[%s1571_s5 + $0x1a8] sm:$0xff]  ;;  %v504_v50 = vld [vmem:[%s1571_s5 + $0x120] sm:$0xff] }
  0x2b   :  { %389 = vmatpush.msrb.mxu1 %v48_v0  ;;  %429 = vmatpush.msrb.mxu3 %v50_v1  ;;  %v520_v51 = vld [vmem:[%s1571_s5 + $0x1a0] sm:$0xff]  ;;  %v471_v52 = vld [vmem:[%s1571_s5 + $0x18] sm:$0xff]  ;;  %v470_v56 = vld [vmem:[%s1571_s5 + $0x10] sm:$0xff] }
  0x2c   :  { %828 = vmatmul.msk.f32.vlgmr.msrb.gmra.mxu0 %vm107_vm0, %v1102_v49  ;;  %829 = vmatmul.msk.f32.vlgmr.msrb.gmra.mxu1 %vm107_vm0, %v1102_v49  ;;  %v487_v53 = vld [vmem:[%s1571_s5 + $0x98] sm:$0xff]  ;;  %v486_v57 = vld [vmem:[%s1571_s5 + $0x90] sm:$0xff]  ;;  %v469_v58 = vld [vmem:[%s1571_s5 + $0x8] sm:$0xff] }
  0x2d   :  { %830 = vmatmul.msk.f32.vlgmr.msrb.gmra.mxu2 %vm107_vm0, %v1102_v49  ;;  %831 = vmatmul.msk.f32.vlgmr.msrb.gmra.mxu3 %vm107_vm0, %v1102_v49  ;;  %v503_v54 = vld [vmem:[%s1571_s5 + $0x118] sm:$0xff]  ;;  %v485_v59 = vld [vmem:[%s1571_s5 + $0x88] sm:$0xff]  ;;  %v468_v60 = vld [vmem:[%s1571_s5] sm:$0xff] }
  0x2e   :  { %600 = vmatpush.msra.mxu0 %v483_v2  ;;  %620 = vmatpush.msra.mxu1 %v499_v3  ;;  %v519_v55 = vld [vmem:[%s1571_s5 + $0x198] sm:$0xff]  ;;  %v484_v61 = vld [vmem:[%s1571_s5 + $0x80] sm:$0xff]  ;;  %v502_v0 = vld [vmem:[%s1571_s5 + $0x110] sm:$0xff] }
  0x2f   :  { %640 = vmatpush.msra.mxu2 %v515_v4  ;;  %660 = vmatpush.msra.mxu3 %v531_v5  ;;  %v547_v62 = vld [vmem:[%s1571_s5 + $0x278] sm:$0xff]  ;;  %v518_v1 = vld [vmem:[%s1571_s5 + $0x190] sm:$0xff]  ;;  %v501_v4 = vld [vmem:[%s1571_s5 + $0x108] sm:$0xff] }
  0x30   :  { %601 = vmatpush.msra.mxu0 %v482_v6  ;;  %621 = vmatpush.msra.mxu1 %v498_v7  ;;  %v563_v63 = vld [vmem:[%s1571_s5 + $0x2f8] sm:$0xff]  ;;  %v546_v2 = vld [vmem:[%s1571_s5 + $0x270] sm:$0xff]  ;;  %v517_v5 = vld [vmem:[%s1571_s5 + $0x188] sm:$0xff] }
  0x31   :  { %641 = vmatpush.msra.mxu2 %v514_v8  ;;  %661 = vmatpush.msra.mxu3 %v530_v9  ;;  %v562_v3 = vld [vmem:[%s1571_s5 + $0x2f0] sm:$0xff]  ;;  %v545_v6 = vld [vmem:[%s1571_s5 + $0x268] sm:$0xff]  ;;  %v500_v8 = vld [vmem:[%s1571_s5 + $0x100] sm:$0xff] }
  0x32   :  { %602 = vmatpush.msra.mxu0 %v481_v10  ;;  %622 = vmatpush.msra.mxu1 %v497_v11  ;;  %v561_v7 = vld [vmem:[%s1571_s5 + $0x2e8] sm:$0xff]  ;;  %v516_v9 = vld [vmem:[%s1571_s5 + $0x180] sm:$0xff] }
  0x33   :  { %642 = vmatpush.msra.mxu2 %v513_v12  ;;  %662 = vmatpush.msra.mxu3 %v529_v13  ;;  %v544_v10 = vld [vmem:[%s1571_s5 + $0x260] sm:$0xff]  ;;  %v579_v12 = vld [vmem:[%s1571_s5 + $0x378] sm:$0xff] }
  0x34   :  { %603 = vmatpush.msra.mxu0 %v480_v14  ;;  %623 = vmatpush.msra.mxu1 %v496_v15  ;;  %v560_v11 = vld [vmem:[%s1571_s5 + $0x2e0] sm:$0xff]  ;;  %v595_v13 = vld [vmem:[%s1571_s5 + $0x3f8] sm:$0xff] }
  0x35   :  { %643 = vmatpush.msra.mxu2 %v512_v17  ;;  %663 = vmatpush.msra.mxu3 %v528_v18  ;;  %v543_v14 = vld [vmem:[%s1571_s5 + $0x258] sm:$0xff]  ;;  %v578_v17 = vld [vmem:[%s1571_s5 + $0x370] sm:$0xff] }
  0x36   :  { %604 = vmatpush.msra.mxu0 %v479_v19  ;;  %624 = vmatpush.msra.mxu1 %v495_v20  ;;  %v559_v15 = vld [vmem:[%s1571_s5 + $0x2d8] sm:$0xff]  ;;  %v594_v18 = vld [vmem:[%s1571_s5 + $0x3f0] sm:$0xff] }
  0x37   :  { %644 = vmatpush.msra.mxu2 %v511_v21  ;;  %664 = vmatpush.msra.mxu3 %v527_v22  ;;  %v542_v19 = vld [vmem:[%s1571_s5 + $0x250] sm:$0xff]  ;;  %v577_v21 = vld [vmem:[%s1571_s5 + $0x368] sm:$0xff] }
  0x38   :  { %605 = vmatpush.msra.mxu0 %v478_v23  ;;  %625 = vmatpush.msra.mxu1 %v494_v24  ;;  %v558_v20 = vld [vmem:[%s1571_s5 + $0x2d0] sm:$0xff]  ;;  %v593_v22 = vld [vmem:[%s1571_s5 + $0x3e8] sm:$0xff] }
  0x39   :  { %645 = vmatpush.msra.mxu2 %v510_v25  ;;  %665 = vmatpush.msra.mxu3 %v526_v26  ;;  %v541_v23 = vld [vmem:[%s1571_s5 + $0x248] sm:$0xff]  ;;  %v576_v25 = vld [vmem:[%s1571_s5 + $0x360] sm:$0xff] }
  0x3a   :  { %606 = vmatpush.msra.mxu0 %v477_v27  ;;  %626 = vmatpush.msra.mxu1 %v493_v28  ;;  %v557_v24 = vld [vmem:[%s1571_s5 + $0x2c8] sm:$0xff]  ;;  %v592_v26 = vld [vmem:[%s1571_s5 + $0x3e0] sm:$0xff] }
  0x3b   :  { %646 = vmatpush.msra.mxu2 %v509_v29  ;;  %666 = vmatpush.msra.mxu3 %v525_v30  ;;  %v540_v27 = vld [vmem:[%s1571_s5 + $0x240] sm:$0xff]  ;;  %v575_v29 = vld [vmem:[%s1571_s5 + $0x358] sm:$0xff] }
  0x3c   :  { %607 = vmatpush.msra.mxu0 %v476_v31  ;;  %627 = vmatpush.msra.mxu1 %v492_v32  ;;  %v556_v28 = vld [vmem:[%s1571_s5 + $0x2c0] sm:$0xff]  ;;  %v591_v30 = vld [vmem:[%s1571_s5 + $0x3d8] sm:$0xff] }
  0x3d   :  { %647 = vmatpush.msra.mxu2 %v508_v33  ;;  %667 = vmatpush.msra.mxu3 %v524_v34  ;;  %v539_v31 = vld [vmem:[%s1571_s5 + $0x238] sm:$0xff]  ;;  %v574_v33 = vld [vmem:[%s1571_s5 + $0x350] sm:$0xff] }
  0x3e   :  { %608 = vmatpush.msra.mxu0 %v475_v35  ;;  %628 = vmatpush.msra.mxu1 %v491_v36  ;;  %v555_v32 = vld [vmem:[%s1571_s5 + $0x2b8] sm:$0xff]  ;;  %v590_v34 = vld [vmem:[%s1571_s5 + $0x3d0] sm:$0xff] }
  0x3f   :  { %648 = vmatpush.msra.mxu2 %v507_v37  ;;  %668 = vmatpush.msra.mxu3 %v523_v38  ;;  %v538_v35 = vld [vmem:[%s1571_s5 + $0x230] sm:$0xff]  ;;  %v573_v37 = vld [vmem:[%s1571_s5 + $0x348] sm:$0xff] }
  0x40   :  { %609 = vmatpush.msra.mxu0 %v474_v39  ;;  %629 = vmatpush.msra.mxu1 %v490_v40  ;;  %v554_v36 = vld [vmem:[%s1571_s5 + $0x2b0] sm:$0xff]  ;;  %v589_v38 = vld [vmem:[%s1571_s5 + $0x3c8] sm:$0xff] }
  0x41   :  { %649 = vmatpush.msra.mxu2 %v506_v41  ;;  %669 = vmatpush.msra.mxu3 %v522_v42  ;;  %v537_v39 = vld [vmem:[%s1571_s5 + $0x228] sm:$0xff]  ;;  %v572_v41 = vld [vmem:[%s1571_s5 + $0x340] sm:$0xff] }
  0x42   :  { %610 = vmatpush.msra.mxu0 %v473_v43  ;;  %630 = vmatpush.msra.mxu1 %v489_v44  ;;  %v553_v40 = vld [vmem:[%s1571_s5 + $0x2a8] sm:$0xff]  ;;  %v588_v42 = vld [vmem:[%s1571_s5 + $0x3c0] sm:$0xff] }
  0x43   :  { %650 = vmatpush.msra.mxu2 %v505_v45  ;;  %670 = vmatpush.msra.mxu3 %v521_v46  ;;  %v536_v43 = vld [vmem:[%s1571_s5 + $0x220] sm:$0xff]  ;;  %v571_v45 = vld [vmem:[%s1571_s5 + $0x338] sm:$0xff] }
  0x44   :  { %611 = vmatpush.msra.mxu0 %v472_v47  ;;  %631 = vmatpush.msra.mxu1 %v488_v48  ;;  %v552_v44 = vld [vmem:[%s1571_s5 + $0x2a0] sm:$0xff]  ;;  %v587_v46 = vld [vmem:[%s1571_s5 + $0x3b8] sm:$0xff] }
  0x45   :  { %651 = vmatpush.msra.mxu2 %v504_v50  ;;  %671 = vmatpush.msra.mxu3 %v520_v51  ;;  %v535_v47 = vld [vmem:[%s1571_s5 + $0x218] sm:$0xff]  ;;  %v570_v50 = vld [vmem:[%s1571_s5 + $0x330] sm:$0xff] }
  0x46   :  { %612 = vmatpush.msra.mxu0 %v471_v52  ;;  %632 = vmatpush.msra.mxu1 %v487_v53  ;;  %v551_v48 = vld [vmem:[%s1571_s5 + $0x298] sm:$0xff]  ;;  %v586_v51 = vld [vmem:[%s1571_s5 + $0x3b0] sm:$0xff] }
  0x47   :  { %652 = vmatpush.msra.mxu2 %v503_v54  ;;  %672 = vmatpush.msra.mxu3 %v519_v55  ;;  %v534_v54 = vld [vmem:[%s1571_s5 + $0x210] sm:$0xff] }
  0x48   :  { %613 = vmatpush.msra.mxu0 %v470_v56  ;;  %633 = vmatpush.msra.mxu1 %v486_v57  ;;  %v550_v55 = vld [vmem:[%s1571_s5 + $0x290] sm:$0xff]  ;;  %v569_v56 = vld [vmem:[%s1571_s5 + $0x328] sm:$0xff] }
  0x49   :  { %653 = vmatpush.msra.mxu2 %v502_v0  ;;  %673 = vmatpush.msra.mxu3 %v518_v1  ;;  %v585_v57 = vld [vmem:[%s1571_s5 + $0x3a8] sm:$0xff]  ;;  %v567_v0 = vld [vmem:[%s1571_s5 + $0x318] sm:$0xff] }
  0x4a   :  { %614 = vmatpush.msra.mxu0 %v469_v58  ;;  %634 = vmatpush.msra.mxu1 %v485_v59  ;;  %v533_v58 = vld [vmem:[%s1571_s5 + $0x208] sm:$0xff]  ;;  %v583_v1 = vld [vmem:[%s1571_s5 + $0x398] sm:$0xff] }
  0x4b   :  { %654 = vmatpush.msra.mxu2 %v501_v4  ;;  %674 = vmatpush.msra.mxu3 %v517_v5  ;;  %v549_v59 = vld [vmem:[%s1571_s5 + $0x288] sm:$0xff] }
  0x4c   :  { %615 = vmatpush.msra.mxu0 %v468_v60  ;;  %635 = vmatpush.msra.mxu1 %v484_v61  ;;  %v568_v60 = vld [vmem:[%s1571_s5 + $0x320] sm:$0xff] }
  0x4d   :  { %655 = vmatpush.msra.mxu2 %v500_v8  ;;  %675 = vmatpush.msra.mxu3 %v516_v9  ;;  %v584_v61 = vld [vmem:[%s1571_s5 + $0x3a0] sm:$0xff] }
  0x4e   :  { %680 = vmatpush.msrb.mxu0 %v547_v62  ;;  %700 = vmatpush.msrb.mxu1 %v563_v63  ;;  %v532_v62 = vld [vmem:[%s1571_s5 + $0x200] sm:$0xff] }
  0x4f   :  { %720 = vmatpush.msrb.mxu2 %v579_v12  ;;  %740 = vmatpush.msrb.mxu3 %v595_v13  ;;  %v548_v63 = vld [vmem:[%s1571_s5 + $0x280] sm:$0xff] }
  0x50   :  { %681 = vmatpush.msrb.mxu0 %v546_v2  ;;  %701 = vmatpush.msrb.mxu1 %v562_v3  ;;  %v566_v2 = vld [vmem:[%s1571_s5 + $0x310] sm:$0xff]  ;;  %v434_v12 = vld [vmem:[%s1570_s4] sm:$0xff] }
  0x51   :  { %721 = vmatpush.msrb.mxu2 %v578_v17  ;;  %741 = vmatpush.msrb.mxu3 %v594_v18  ;;  %v582_v3 = vld [vmem:[%s1571_s5 + $0x390] sm:$0xff]  ;;  %v437_v17 = vperm.slane %v434_v12, 1 }
  0x52   :  { %682 = vmatpush.msrb.mxu0 %v545_v6  ;;  %702 = vmatpush.msrb.mxu1 %v561_v7  ;;  %v565_v6 = vld [vmem:[%s1571_s5 + $0x308] sm:$0xff] }
  0x53   :  { %722 = vmatpush.msrb.mxu2 %v577_v21  ;;  %742 = vmatpush.msrb.mxu3 %v593_v22  ;;  %v581_v7 = vld [vmem:[%s1571_s5 + $0x388] sm:$0xff] }
  0x54   :  { %683 = vmatpush.msrb.mxu0 %v544_v10  ;;  %703 = vmatpush.msrb.mxu1 %v560_v11  ;;  %v564_v10 = vld [vmem:[%s1571_s5 + $0x300] sm:$0xff] }
  0x55   :  { %723 = vmatpush.msrb.mxu2 %v576_v25  ;;  %743 = vmatpush.msrb.mxu3 %v592_v26  ;;  %v580_v11 = vld [vmem:[%s1571_s5 + $0x380] sm:$0xff]  ;;  %v438_v26 = vperm.slane %v434_v12, 2 }
  0x56   :  { %684 = vmatpush.msrb.mxu0 %v543_v14  ;;  %704 = vmatpush.msrb.mxu1 %v559_v15  ;;  %v436_v15 = vperm.slane %v434_v12, 0 }
  0x57   :  { %724 = vmatpush.msrb.mxu2 %v575_v29  ;;  %744 = vmatpush.msrb.mxu3 %v591_v30 }
  0x58   :  { %685 = vmatpush.msrb.mxu0 %v542_v19  ;;  %705 = vmatpush.msrb.mxu1 %v558_v20 }
  0x59   :  { %725 = vmatpush.msrb.mxu2 %v574_v33  ;;  %745 = vmatpush.msrb.mxu3 %v590_v34  ;;  %v441_v33 = vperm.slane %v434_v12, 5 }
  0x5a   :  { %686 = vmatpush.msrb.mxu0 %v541_v23  ;;  %706 = vmatpush.msrb.mxu1 %v557_v24 }
  0x5b   :  { %726 = vmatpush.msrb.mxu2 %v573_v37  ;;  %746 = vmatpush.msrb.mxu3 %v589_v38 }
  0x5c   :  { %687 = vmatpush.msrb.mxu0 %v540_v27  ;;  %707 = vmatpush.msrb.mxu1 %v556_v28  ;;  %v439_v27 = vperm.slane %v434_v12, 3 }
  0x5d   :  { %727 = vmatpush.msrb.mxu2 %v572_v41  ;;  %747 = vmatpush.msrb.mxu3 %v588_v42 }
  0x5e   :  { %688 = vmatpush.msrb.mxu0 %v539_v31  ;;  %708 = vmatpush.msrb.mxu1 %v555_v32  ;;  %v440_v32 = vperm.slane %v434_v12, 4 }
  0x5f   :  { %728 = vmatpush.msrb.mxu2 %v571_v45  ;;  %748 = vmatpush.msrb.mxu3 %v587_v46  ;;  %v442_v46 = vperm.slane %v434_v12, 6 }
  0x60   :  { %689 = vmatpush.msrb.mxu0 %v538_v35  ;;  %709 = vmatpush.msrb.mxu1 %v554_v36 }
  0x61   :  { %729 = vmatpush.msrb.mxu2 %v570_v50  ;;  %749 = vmatpush.msrb.mxu3 %v586_v51 }
  0x62   :  { %690 = vmatpush.msrb.mxu0 %v537_v39  ;;  %710 = vmatpush.msrb.mxu1 %v553_v40 }
  0x63   :  { %730 = vmatpush.msrb.mxu2 %v569_v56  ;;  %750 = vmatpush.msrb.mxu3 %v585_v57  ;;  %v835_v57 = vld [vmem:[%s1572_s6] ss:$0 sm:$0xff]  ;;  %s893_s6 = smov [#allocation5]  }
  0x64   :  { %691 = vmatpush.msrb.mxu0 %v536_v43  ;;  %711 = vmatpush.msrb.mxu1 %v552_v44  ;;  %s804_s21 = sshll.u32 %s893_s6, 4  ;;  %s805_s21 = int_to_ptr.vmem [resolvable:$true] %s804_s21 }
  0x65   :  { %731 = vmatpush.msrb.mxu2 %v568_v60  ;;  %751 = vmatpush.msrb.mxu3 %v584_v61 }
  0x66   :  { %692 = vmatpush.msrb.mxu0 %v535_v47  ;;  %712 = vmatpush.msrb.mxu1 %v551_v48  ;;  %v443_v47 = vperm.slane %v434_v12, 7 }
  0x67   :  { %732 = vmatpush.msrb.mxu2 %v567_v0  ;;  %752 = vmatpush.msrb.mxu3 %v583_v1 }
  0x68   :  { %693 = vmatpush.msrb.mxu0 %v534_v54  ;;  %713 = vmatpush.msrb.mxu1 %v550_v55 }
  0x69   :  { %733 = vmatpush.msrb.mxu2 %v566_v2  ;;  %753 = vmatpush.msrb.mxu3 %v582_v3 }
  0x6a   :  { %694 = vmatpush.msrb.mxu0 %v533_v58  ;;  %714 = vmatpush.msrb.mxu1 %v549_v59 }
  0x6b   :  { %734 = vmatpush.msrb.mxu2 %v565_v6  ;;  %754 = vmatpush.msrb.mxu3 %v581_v7 }
  0x6c   :  { %695 = vmatpush.msrb.mxu0 %v532_v62  ;;  %715 = vmatpush.msrb.mxu1 %v548_v63 }
  0x6d   :  { %735 = vmatpush.msrb.mxu2 %v564_v10  ;;  %755 = vmatpush.msrb.mxu3 %v580_v11 }
  0x8b   :  { %v128_v52 = vpop.f32.mrf.mxu0  ;;  %v148_v53 = vpop.f32.mrf.mxu1 }
  0x92   :  { %v168_v4 = vpop.f32.mrf.mxu2  ;;  %v188_v5 = vpop.f32.mrf.mxu3 }
  0x95   :  { %v208_v8 = vpop.f32.mrf.mxu0  ;;  %v228_v9 = vpop.f32.mrf.mxu1 }
  0x9c   :  { %v248_v13 = vpop.f32.mrf.mxu2  ;;  %v268_v14 = vpop.f32.mrf.mxu3 }
  0x9f   :  { %v291_v18 = vpop.f32.mrf.mxu0  ;;  %v311_v19 = vpop.f32.mrf.mxu1 }
  0xa0   :  { %v292_v20 = vadd.f32 %v291_v18, %v128_v52  ;;  %v312_v21 = vadd.f32 %v311_v19, %v148_v53 }
  0xa2   :  { %v452_v22 = vadd.f32 %v436_v15, %v292_v20  ;;  %v453_v23 = vadd.f32 %v437_v17, %v312_v21 }
  0xa4   :  { %v460_v24 = vmax.f32 %v452_v22, 0.0  ;;  %v461_v25 = vmax.f32 %v453_v23, 0.0  ;;  %v779_v23 = vsub.f32 %v1102_v49, %v988_v16 }
  0xa6   :  { %v331_v28 = vpop.f32.mrf.mxu2  ;;  %v351_v29 = vpop.f32.mrf.mxu3  ;;  %616 = vmatmul.f32.vlgmr.msra.gmra.mxu0 %v460_v24  ;;  %636 = vmatmul.f32.vlgmr.msra.gmra.mxu1 %v461_v25 }
  0xa7   :  { %v332_v30 = vadd.f32 %v331_v28, %v168_v4  ;;  %v352_v31 = vadd.f32 %v351_v29, %v188_v5 }
  0xa9   :  { %v454_v34 = vadd.f32 %v438_v26, %v332_v30  ;;  %v455_v35 = vadd.f32 %v439_v27, %v352_v31  ;;  %v371_v36 = vpop.f32.mrf.mxu0  ;;  %v391_v37 = vpop.f32.mrf.mxu1 }
  0xaa   :  { %v372_v38 = vadd.f32 %v371_v36, %v208_v8  ;;  %v392_v39 = vadd.f32 %v391_v37, %v228_v9 }
  0xab   :  { %v462_v40 = vmax.f32 %v454_v34, 0.0  ;;  %v463_v41 = vmax.f32 %v455_v35, 0.0 }
  0xac   :  { %v456_v42 = vadd.f32 %v440_v32, %v372_v38  ;;  %v457_v43 = vadd.f32 %v441_v33, %v392_v39 }
  0xad   :  { %656 = vmatmul.f32.vlgmr.msra.gmra.mxu2 %v462_v40  ;;  %676 = vmatmul.f32.vlgmr.msra.gmra.mxu3 %v463_v41 }
  0xae   :  { %v464_v44 = vmax.f32 %v456_v42, 0.0  ;;  %v465_v45 = vmax.f32 %v457_v43, 0.0 }
  0xb0   :  { %v411_v48 = vpop.f32.mrf.mxu2  ;;  %v431_v50 = vpop.f32.mrf.mxu3  ;;  %696 = vmatmul.f32.vlgmr.msrb.gmra.mxu0 %v464_v44  ;;  %716 = vmatmul.f32.vlgmr.msrb.gmra.mxu1 %v465_v45 }
  0xb1   :  { %v412_v51 = vadd.f32 %v411_v48, %v248_v13  ;;  %v432_v52 = vadd.f32 %v431_v50, %v268_v14  ;;  %v782_v14 = vlaneseq }
  0xb3   :  { %v458_v53 = vadd.f32 %v442_v46, %v412_v51  ;;  %v459_v54 = vadd.f32 %v443_v47, %v432_v52  ;;  %v783_v19 = vand.u32 127, %v782_v14 }
  0xb5   :  { %v466_v55 = vmax.f32 %v458_v53, 0.0  ;;  %v467_v56 = vmax.f32 %v459_v54, 0.0  ;;  %v788_v25 = vand.u32 3, %v783_v19 }
  0xb7   :  { %736 = vmatmul.f32.vlgmr.msrb.gmra.mxu2 %v466_v55  ;;  %756 = vmatmul.f32.vlgmr.msrb.gmra.mxu3 %v467_v56  ;;  %vm796_vm5 = vcmp.ge.s32.totalorder %v788_v25, 2 }
 0x123   :  { %v617_v58 = vpop.f32.mrf.mxu0  ;;  %v637_v60 = vpop.f32.mrf.mxu1 }
 0x124   :  { %v618_v59 = vadd.f32 %v835_v57, %v617_v58 }
 0x126   :  { %v638_v61 = vadd.f32 %v637_v60, %v618_v59 }
 0x12d   :  { %v697_v2 = vpop.f32.mrf.mxu0  ;;  %v717_v4 = vpop.f32.mrf.mxu1 }
 0x130   :  { %v657_v62 = vpop.f32.mrf.mxu2  ;;  %v677_v0 = vpop.f32.mrf.mxu3 }
 0x131   :  { %v658_v63 = vadd.f32 %v657_v62, %v638_v61 }
 0x133   :  { %v678_v1 = vadd.f32 %v677_v0, %v658_v63 }
 0x135   :  { %v698_v3 = vadd.f32 %v697_v2, %v678_v1 }
 0x137   :  { %v718_v5 = vadd.f32 %v717_v4, %v698_v3 }
 0x13a   :  { %v737_v6 = vpop.f32.mrf.mxu2  ;;  %v757_v8 = vpop.f32.mrf.mxu3 }
 0x13b   :  { %v738_v7 = vadd.f32 %v737_v6, %v718_v5 }
 0x13d   :  { %v758_v9 = vadd.f32 %v757_v8, %v738_v7 }
 0x13f   :  { %v832_v10 = vmul.f32 -1.442695, %v758_v9 }
 0x141   :  { %836 = vpow2.f32 %v832_v10 }
 0x147   :  { %v837_v11 = vpop.eup %836 }
 0x148   :  { %v763_v12 = vadd.f32 1.0, %v837_v11 }
 0x14a   :  { %838 = vrcp.f32 %v763_v12  ;;  %v775_v18 = vand.u32 2147483648, %v763_v12  ;;  %v773_v21 = vand.u32 2147483647, %v763_v12  ;;  %vm769_vm2 = vweird.f32 %v763_v12 }
 0x14c   :  { %v776_v24 = vor.u32 1.1754944e-38, %v775_v18  ;;  %vm774_vm4 = vcmp.eq.f32.partialorder %v773_v21, 8.507059e+37 }
 0x150   :  { %v839_v13 = vpop.eup %838 }
 0x151   :  { %v765_v15 = vmul.f32 %v839_v13, %v763_v12  ;;  %vm770_vm1 = vweird.f32 %v839_v13 }
 0x152   :  { %vm771_vm3 = vmor %vm769_vm2, %vm770_vm1 }
 0x153   :  { %v766_v17 = vsub.f32 1.0, %v765_v15 }
 0x155   :  { %v767_v20 = vmul.f32 %v839_v13, %v766_v17 }
 0x157   :  { %v768_v22 = vadd.f32 %v839_v13, %v767_v20 }
 0x159   :  { %v772_v26 = vsel %vm771_vm3, %v839_v13, %v768_v22 }
 0x15a   :  { %v777_v27 = vsel %vm774_vm4, %v776_v24, %v772_v26 }
 0x15b   :  { %v780_v28 = vmul.f32 %v779_v23, %v777_v27 }
 0x15d   :  { %v781_v29 = vadd.f32 %v780_v28, %v988_v16 }
 0x15f   :  { %v797_v30 = vsel %vm796_vm5, %v1102_v49, %v781_v29 }
 0x160   :  { %798 = vst.msk [vmem:[#allocation5] sm:$0xff] %vm107_vm0, %v797_v30 }
 0x161   :  { %809 = dma.vmem_to_hbm [thread:$0]  %s805_s21, 128, %s807_s24, [#allocation4]  }
 0x162   :  { %890 = dma.done.wait [#allocation4], 128  }
 0x163   :  { %891 = vsyncadd [#allocation4], 4294967168 }
 0x164   :  { %814 = vsyncpa [#allocation3], 1 }
 0x165   :  { %815 = vsyncpa [#allocation4], 1 }

</bundles_post_ra>
